<compile_context>
chip_gen: v6e
topology: v6e:2x2x1
jax: 0.10.0
libtpu: 0.0.40
codegen_flags: <defaults>
</compile_context>

<pallas_src>
import numpy as np
import jax
import jax.numpy as jnp
from jax.experimental import pallas as pl
from jax.experimental.pallas import tpu as pltpu

IMAGENET_MEAN = (0.485, 0.456, 0.406)
IMAGENET_STD = (0.229, 0.224, 0.225)
BOX_THRESHOLD = 0.3
TEXT_THRESHOLD = 0.5

LANE_W = 128                 # lane width of every block (multiple of 128)
MAX_TILE_R = 512             # big tiles amortize the ~0.35us/step pipeline overhead
SUBLANE_MULT = 16            # bf16 output blocks stay on native (16,128) tiles
NUM_BOX_DIMS = 4
CH_PAD = 8                   # channel rows padded to one f32 (8,128) sublane tile
FUSE_HEAD_MAX_PIXELS = 512 * 1024   # fuse head epilogue below this image size


def _cdiv(a, b):
    return -(-a // b)


def _round_up(a, b):
    return _cdiv(a, b) * b


def _choose_tiling(hw):
    """tile_r multiple of 16, capped at MAX_TILE_R, grid length T >= 2 when possible."""
    rows = _cdiv(hw, LANE_W)
    rows16 = _round_up(rows, SUBLANE_MULT)
    if rows16 <= SUBLANE_MULT:
        tile_r = SUBLANE_MULT
    else:
        # split into >=2 tiles (v7x has 2 TCs on a "parallel" axis), cap tile size
        tile_r = min(MAX_TILE_R, _round_up(_cdiv(rows16, 2), SUBLANE_MULT))
    num_tiles = _cdiv(rows16, tile_r)
    return tile_r, num_tiles, num_tiles * tile_r


def _prep_image(img_chw):
    """(C,H,W) -> zero-padded lane-dense (C, R_pad, 128) f32 slab + tiling info."""
    C, H, W = img_chw.shape
    hw = H * W
    tile_r, T, R_pad = _choose_tiling(hw)
    flat = img_chw.reshape(C, hw).astype(jnp.float32)
    pad = R_pad * LANE_W - hw
    if pad:
        flat = jnp.pad(flat, ((0, 0), (0, pad)))
    return flat.reshape(C, R_pad, LANE_W), hw, tile_r, T, R_pad


# ---------------------------------------------------------------------------
# In-kernel building blocks
# ---------------------------------------------------------------------------
def _normalize_tile(img_ref, norm_ref, mean, std_inv, hw, tile_r):
    """Normalize one (C, tile_r, 128) tile; return per-channel (1,128) lane sums.

    Only a sublane reduction (axis=0) is done here; the padded tail is masked
    out of the sums (valid element <=> flat index < hw)."""
    t = pl.program_id(0)
    rows = jax.lax.broadcasted_iota(jnp.int32, (tile_r, LANE_W), 0) + t * tile_r
    lanes = jax.lax.broadcasted_iota(jnp.int32, (tile_r, LANE_W), 1)
    valid = (rows * LANE_W + lanes) < hw
    sums = []
    for c in range(len(mean)):                     # static unroll, C=3
        x = (img_ref[c] - mean[c]) * std_inv[c]    # (tile_r, 128) f32, VPU immediates
        norm_ref[c] = x.astype(norm_ref.dtype)     # bf16 writeback
        sums.append(jnp.sum(jnp.where(valid, x, 0.0), axis=0, keepdims=True))
    return sums


def _detection_head(acc, hw, wproj_ref, qemb_ref, text_ref, wbox_ref, bbox_ref,
                    sig_ref, box_ref, num_tokens):
    """acc: (CH_PAD,128) f32, row c = lane-wise sum of normalized channel c."""
    # finish global average pooling: one cross-lane reduce, divide by hw only
    pooled = jnp.sum(acc, axis=1, keepdims=True) * (1.0 / hw)          # (CH_PAD, 1)
    # image-feature projection (rows C..7 of wproj are zero)
    img_feat = jnp.sum(pooled * wproj_ref[...], axis=0, keepdims=True)  # (1, D)
    q = qemb_ref[...] + img_feat                                        # (Q, D)

    # contrastive classification logits: q @ text^T  (text lane-padded to 128 rows)
    logits = jax.lax.dot_general(q, text_ref[...], (((1,), (1,)), ((), ())),
                                 preferred_element_type=jnp.float32)    # (Q, 128)
    col = jax.lax.broadcasted_iota(jnp.int32, logits.shape, 1)
    sig_ref[...] = jnp.where(col < num_tokens, jax.nn.sigmoid(logits), 0.0)

    # box head: sigmoid(q @ Wbox + b), packed into a lane-dense (Q,128) slab
    blog = jnp.dot(q, wbox_ref[...],
                   preferred_element_type=jnp.float32) + bbox_ref[...]
    bcol = jax.lax.broadcasted_iota(jnp.int32, blog.shape, 1)
    box_ref[...] = jnp.where(bcol < NUM_BOX_DIMS, jax.nn.sigmoid(blog), 0.0)


# ---------------------------------------------------------------------------
# Kernel makers
# ---------------------------------------------------------------------------
def _make_fused_kernel(mean, std_inv, hw, tile_r, num_tokens):
    mean = tuple(float(m) for m in mean)
    std_inv = tuple(float(s) for s in std_inv)

    def kernel(img_ref, wproj_ref, qemb_ref, text_ref, wbox_ref, bbox_ref,
               norm_ref, sig_ref, box_ref, acc_ref):
        t = pl.program_id(0)

        @pl.when(t == 0)
        def _():
            acc_ref[...] = jnp.zeros_like(acc_ref)

        sums = _normalize_tile(img_ref, norm_ref, mean, std_inv, hw, tile_r)
        for c, s in enumerate(sums):               # accumulate in VMEM scratch
            acc_ref[pl.ds(c, 1), :] = acc_ref[pl.ds(c, 1), :] + s

        @pl.when(t == pl.num_programs(0) - 1)      # head as last-step epilogue
        def _():
            _detection_head(acc_ref[...], hw, wproj_ref, qemb_ref, text_ref,
                            wbox_ref, bbox_ref, sig_ref, box_ref, num_tokens)

    return kernel


def _make_normalize_kernel(mean, std_inv, hw, tile_r):
    mean = tuple(float(m) for m in mean)
    std_inv = tuple(float(s) for s in std_inv)

    def kernel(img_ref, norm_ref, partial_ref):
        partial_ref[...] = jnp.zeros_like(partial_ref)     # (CH_PAD, 128) block
        sums = _normalize_tile(img_ref, norm_ref, mean, std_inv, hw, tile_r)
        for c, s in enumerate(sums):
            partial_ref[pl.ds(c, 1), :] = s

    return kernel


def _make_head_kernel(hw, num_tiles, num_tokens):
    def kernel(partial_ref, wproj_ref, qemb_ref, text_ref, wbox_ref, bbox_ref,
               sig_ref, box_ref):
        acc = jnp.sum(partial_ref[...].reshape(num_tiles, CH_PAD, LANE_W), axis=0)
        _detection_head(acc, hw, wproj_ref, qemb_ref, text_ref,
                        wbox_ref, bbox_ref, sig_ref, box_ref, num_tokens)

    return kernel


# ---------------------------------------------------------------------------
# Forward wrapper
# ---------------------------------------------------------------------------
def grounding_dino_forward(image_chw, params, num_tokens, fuse_head=None):
    """Normalize + GAP + contrastive/box head. Returns (norm_img, sig_pad, box_pad)."""
    C, H, W = image_chw.shape
    img3d, hw, tile_r, T, R_pad = _prep_image(image_chw)
    wproj_pad, qemb, text_pad, wbox_pad, bbox_pad = params
    Q, D = qemb.shape

    if fuse_head is None:
        # Small images: fuse the head epilogue (saves one launch + partial HBM
        # round trip).  Large images: keep the split so the memory-bound pass
        # keeps a "parallel" grid and both v7x TensorCores share it.
        fuse_head = hw <= FUSE_HEAD_MAX_PIXELS

    mean = IMAGENET_MEAN
    std_inv = tuple(1.0 / s for s in IMAGENET_STD)

    img_spec = pl.BlockSpec((C, tile_r, LANE_W), lambda t: (0, t, 0))
    norm_spec = pl.BlockSpec((C, tile_r, LANE_W), lambda t: (0, t, 0))
    param_specs = [pl.BlockSpec(p.shape, lambda t: (0, 0)) for p in params]
    head_out_specs = [pl.BlockSpec((Q, LANE_W), lambda t: (0, 0)),
                      pl.BlockSpec((Q, LANE_W), lambda t: (0, 0))]
    head_out_shape = (jax.ShapeDtypeStruct((Q, LANE_W), jnp.float32),
                      jax.ShapeDtypeStruct((Q, LANE_W), jnp.float32))
    norm_shape = jax.ShapeDtypeStruct((C, R_pad, LANE_W), jnp.bfloat16)

    # footprint: (f32 in + bf16 out) tile x 2 buffers + small head params;
    # <= ~2.5 MiB even at tile_r=512, well under every generation's scoped-VMEM
    # default (16 MiB v5e / 32 MiB v6e-v7x) -> no vmem_limit_bytes override needed.
    if fuse_head:
        kernel = _make_fused_kernel(mean, std_inv, hw, tile_r, num_tokens)
        norm3d, sig_pad, box_pad = pl.pallas_call(
            kernel,
            grid=(T,),
            in_specs=[img_spec] + param_specs,
            out_specs=[norm_spec] + head_out_specs,
            out_shape=(norm_shape,) + head_out_shape,
            scratch_shapes=[pltpu.VMEM((CH_PAD, LANE_W), jnp.float32)],
            compiler_params=pltpu.CompilerParams(
                dimension_semantics=("arbitrary",)),   # serial: scratch carries sums
        )(img3d, *params)
    else:
        norm_kernel = _make_normalize_kernel(mean, std_inv, hw, tile_r)
        norm3d, partial = pl.pallas_call(
            norm_kernel,
            grid=(T,),
            in_specs=[img_spec],
            out_specs=[norm_spec,
                       pl.BlockSpec((CH_PAD, LANE_W), lambda t: (t, 0))],
            out_shape=(norm_shape,
                       jax.ShapeDtypeStruct((T * CH_PAD, LANE_W), jnp.float32)),
            compiler_params=pltpu.CompilerParams(
                dimension_semantics=("parallel",)),    # independent tiles -> 2 TCs on v7x
        )(img3d)
        head_kernel = _make_head_kernel(hw, T, num_tokens)
        sig_pad, box_pad = pl.pallas_call(
            head_kernel,
            grid=(1,),
            in_specs=[pl.BlockSpec((T * CH_PAD, LANE_W), lambda t: (0, 0))] + param_specs,
            out_specs=head_out_specs,
            out_shape=head_out_shape,
        )(partial, *params)

    norm_img = norm3d.reshape(C, R_pad * LANE_W)[:, :hw].reshape(C, H, W)
    return norm_img, sig_pad, box_pad


# ---------------------------------------------------------------------------
# Host-side post-processing (dynamic-shape filtering + phrase strings, exactly
# as the PyTorch forward does after `.cpu()`).
# ---------------------------------------------------------------------------
def postprocess(sig_pad, box_pad, tokens, num_tokens):
    # TODO(synk): real BERT tokenizer / get_phrases_from_posmap has no Pallas
    # equivalent; synthetic whitespace tokens are used for phrase assembly.
    sig = np.asarray(sig_pad, dtype=np.float32)[:, :num_tokens]
    boxes = np.asarray(box_pad, dtype=np.float32)[:, :NUM_BOX_DIMS]

    mx = sig.max(axis=1)                       # logits.max(dim=1)[0]  (host, as in torch)
    filt_mask = mx > BOX_THRESHOLD
    logits_filt = sig[filt_mask]
    boxes_filt = boxes[filt_mask]

    pred_phrases, keep = [], []
    for logit in logits_filt:
        pos = logit > TEXT_THRESHOLD
        if pos.any():
            phrase = " ".join(tokens[j] for j in np.nonzero(pos)[0])
            pred_phrases.append(phrase + f"({str(float(logit.max()))[:4]})")
            keep.append(True)
        else:
            keep.append(False)
    keep = np.asarray(keep, dtype=bool) if keep else np.zeros((0,), dtype=bool)
    boxes_filt = boxes_filt[keep]
    return boxes_filt, pred_phrases


# ---------------------------------------------------------------------------
# Synthetic parameters + pure-JAX reference
# ---------------------------------------------------------------------------
def _build_params(key, C, Q, L, D, vocab, token_ids):
    k_proj, k_q, k_emb, k_box, k_bias = jax.random.split(key, 5)
    emb_table = jax.random.normal(k_emb, (vocab, D), dtype=jnp.float32)
    text_feats = emb_table[token_ids]                                     # (L, D)
    w_proj = jax.random.normal(k_proj, (C, D), dtype=jnp.float32) * 0.5   # (C, D)
    q_embed = jax.random.normal(k_q, (Q, D), dtype=jnp.float32) * 0.5     # (Q, D)
    w_box = jax.random.normal(k_box, (D, NUM_BOX_DIMS), dtype=jnp.float32) * 0.3
    b_box = jax.random.normal(k_bias, (1, NUM_BOX_DIMS), dtype=jnp.float32) * 0.1

    wproj_pad = jnp.zeros((CH_PAD, D), jnp.float32).at[:C].set(w_proj)
    text_pad = jnp.zeros((LANE_W, D), jnp.float32).at[:L].set(text_feats)
    wbox_pad = jnp.zeros((D, LANE_W), jnp.float32).at[:, :NUM_BOX_DIMS].set(w_box)
    bbox_pad = jnp.zeros((1, LANE_W), jnp.float32).at[:, :NUM_BOX_DIMS].set(b_box)

    params = (wproj_pad, q_embed, text_pad, wbox_pad, bbox_pad)
    raw = dict(text_feats=text_feats, w_proj=w_proj, q_embed=q_embed,
               w_box=w_box, b_box=b_box)
    return params, raw


def _reference(image_chw, raw):
    C = image_chw.shape[0]
    mean_arr = jnp.array(IMAGENET_MEAN, jnp.float32).reshape(C, 1, 1)
    std_arr = jnp.array(IMAGENET_STD, jnp.float32).reshape(C, 1, 1)
    norm = (image_chw - mean_arr) / std_arr
    pooled = jnp.mean(norm, axis=(1, 2))                                  # (C,)
    q = raw["q_embed"] + pooled @ raw["w_proj"]
    sig = jax.nn.sigmoid(q @ raw["text_feats"].T)                         # (Q, L)
    box = jax.nn.sigmoid(q @ raw["w_box"] + raw["b_box"])                 # (Q, 4)
    return norm, sig, box


if __name__ == "__main__":
    key = jax.random.PRNGKey(0)
    k_img, k_img2, k_par = jax.random.split(key, 3)

    # small shapes: single image, C=3; Q=16 queries, L=8 text tokens, D=32 hidden
    C, Q, L, D = 3, 16, 8, 32
    vocab = 32

    det_prompt = "a hat and a dog on grass"
    if not det_prompt.endswith("."):
        det_prompt += "."
    tokens = det_prompt.replace(".", " .").split()[:L]
    while len(tokens) < L:
        tokens.append("[PAD]")
    token_ids = jnp.array([sum(ord(ch) for ch in t) % vocab for t in tokens],
                          dtype=jnp.int32)

    params, raw = _build_params(k_par, C, Q, L, D, vocab, token_ids)

    # image 1: 128x128 (H*W divides 128-lane rows evenly, grid T=2)
    image1 = jax.random.uniform(k_img, (1, C, 128, 128), dtype=jnp.float32)
    # image 2: 50x50 (H*W NOT a multiple of 128 -> exercises padded/masked tail)
    image2 = jax.random.uniform(k_img2, (1, C, 50, 50), dtype=jnp.float32)

    def run_and_check(image_nchw, fuse_head):
        norm_img, sig_pad, box_pad = grounding_dino_forward(
            image_nchw[0], params, L, fuse_head=fuse_head)
        jax.block_until_ready((norm_img, sig_pad, box_pad))
        norm_ref, sig_ref, box_ref = _reference(image_nchw[0], raw)
        np.testing.assert_allclose(np.asarray(norm_img, dtype=np.float32),
                                   np.asarray(norm_ref), rtol=0.05, atol=0.05)
        np.testing.assert_allclose(np.asarray(sig_pad)[:, :L],
                                   np.asarray(sig_ref), rtol=1e-3, atol=1e-4)
        np.testing.assert_allclose(np.asarray(box_pad)[:, :NUM_BOX_DIMS],
                                   np.asarray(box_ref), rtol=1e-3, atol=1e-4)
        return sig_pad, box_pad

    # fused epilogue path (default for small images on v5e/v6e), split
    # "parallel" path (large images / v7x), and padded/masked-tail path
    sig_pad, box_pad = run_and_check(image1, fuse_head=True)
    run_and_check(image1, fuse_head=False)
    run_and_check(image2, fuse_head=True)

    # host post-processing (dynamic filtering + phrase strings, as in torch)
    boxes_filt, pred_phrases = postprocess(sig_pad, box_pad, tokens, L)
    assert boxes_filt.ndim == 2 and boxes_filt.shape[1] == NUM_BOX_DIMS
    assert len(pred_phrases) == boxes_filt.shape[0]
    print("KERNEL_OK")
</pallas_src>

<mosaic_0001>
module attributes {stable_mosaic.version = 11 : i64} {
  func.func @kernel(%arg0: i32, %arg1: memref<3x64x128xf32, #tpu.memory_space<vmem>>, %arg2: memref<8x32xf32, #tpu.memory_space<vmem>>, %arg3: memref<16x32xf32, #tpu.memory_space<vmem>>, %arg4: memref<128x32xf32, #tpu.memory_space<vmem>>, %arg5: memref<32x128xf32, #tpu.memory_space<vmem>>, %arg6: memref<1x128xf32, #tpu.memory_space<vmem>>, %arg7: memref<3x64x128xbf16, #tpu.memory_space<vmem>>, %arg8: memref<16x128xf32, #tpu.memory_space<vmem>>, %arg9: memref<16x128xf32, #tpu.memory_space<vmem>>, %arg10: memref<8x128xf32, #tpu.memory_space<vmem>>) attributes {dimension_semantics = [#tpu.dimension_semantics<arbitrary>], iteration_bounds = array<i64: 2>, scalar_prefetch = 0 : i64, scratch_operands = 1 : i64, tpu.core_type = #tpu.core_type<tc>, window_params = [{transform_indices = @transform_0, window_bounds = array<i64: 3, 64, 128>}, {pipeline_mode = #tpu.pipeline_mode<synchronous>, transform_indices = @transform_1, window_bounds = array<i64: 8, 32>}, {pipeline_mode = #tpu.pipeline_mode<synchronous>, transform_indices = @transform_2, window_bounds = array<i64: 16, 32>}, {pipeline_mode = #tpu.pipeline_mode<synchronous>, transform_indices = @transform_3, window_bounds = array<i64: 128, 32>}, {pipeline_mode = #tpu.pipeline_mode<synchronous>, transform_indices = @transform_4, window_bounds = array<i64: 32, 128>}, {pipeline_mode = #tpu.pipeline_mode<synchronous>, transform_indices = @transform_5, window_bounds = array<i64: 1, 128>}, {transform_indices = @transform_6, window_bounds = array<i64: 3, 64, 128>}, {pipeline_mode = #tpu.pipeline_mode<synchronous>, transform_indices = @transform_7, window_bounds = array<i64: 16, 128>}, {pipeline_mode = #tpu.pipeline_mode<synchronous>, transform_indices = @transform_8, window_bounds = array<i64: 16, 128>}]} {
    %c0_i32 = arith.constant 0 : i32
    %0 = arith.cmpi eq, %arg0, %c0_i32 : i32
    %1 = arith.extui %0 : i1 to i32
    %c0_i32_0 = arith.constant 0 : i32
    %2 = arith.cmpi ne, %1, %c0_i32_0 : i32
    scf.if %2 {
      %cst_40 = arith.constant 0.000000e+00 : f32
      %67 = vector.broadcast %cst_40 : f32 to vector<8x128xf32>
      %c0_41 = arith.constant 0 : index
      %c0_42 = arith.constant 0 : index
      %68 = vector.load %arg10[%c0_41, %c0_42] : memref<8x128xf32, #tpu.memory_space<vmem>>, vector<8x128xf32>
      tpu.vector_store %arg10[%c0_41, %c0_42], %67 {strides = array<i32>} : memref<8x128xf32, #tpu.memory_space<vmem>>, vector<8x128xf32>,
    } else {
    }
    %3 = tpu.iota {dimensions = array<i32: 0>} : vector<64x128xi32>
    %c64_i32 = arith.constant 64 : i32
    %4 = arith.muli %arg0, %c64_i32 : i32
    %5 = vector.broadcast %4 : i32 to vector<64x128xi32>
    %6 = arith.addi %3, %5 : vector<64x128xi32>
    %7 = tpu.iota {dimensions = array<i32: 1>} : vector<64x128xi32>
    %c128_i32 = arith.constant 128 : i32
    %8 = vector.broadcast %c128_i32 : i32 to vector<64x128xi32>
    %9 = arith.muli %6, %8 : vector<64x128xi32>
    %10 = arith.addi %9, %7 : vector<64x128xi32>
    %c16384_i32 = arith.constant 16384 : i32
    %11 = vector.broadcast %c16384_i32 : i32 to vector<64x128xi32>
    %12 = arith.cmpi slt, %10, %11 : vector<64x128xi32>
    %c0 = arith.constant 0 : index
    %c0_1 = arith.constant 0 : index
    %c0_2 = arith.constant 0 : index
    %13 = vector.load %arg1[%c0, %c0_1, %c0_2] : memref<3x64x128xf32, #tpu.memory_space<vmem>>, vector<1x64x128xf32>
    %14 = vector.shape_cast %13 : vector<1x64x128xf32> to vector<64x128xf32>
    %cst = arith.constant 4.850000e-01 : f32
    %15 = vector.broadcast %cst : f32 to vector<64x128xf32>
    %16 = arith.subf %14, %15 : vector<64x128xf32>
    %cst_3 = arith.constant 4.36681223 : f32
    %17 = vector.broadcast %cst_3 : f32 to vector<64x128xf32>
    %18 = arith.mulf %16, %17 : vector<64x128xf32>
    %19 = arith.truncf %18 : vector<64x128xf32> to vector<64x128xbf16>
    %c0_4 = arith.constant 0 : index
    %c0_5 = arith.constant 0 : index
    %c0_6 = arith.constant 0 : index
    %20 = vector.load %arg7[%c0_4, %c0_5, %c0_6] : memref<3x64x128xbf16, #tpu.memory_space<vmem>>, vector<1x64x128xbf16>
    %21 = vector.shape_cast %20 : vector<1x64x128xbf16> to vector<64x128xbf16>
    %22 = vector.shape_cast %19 : vector<64x128xbf16> to vector<1x64x128xbf16>
    tpu.vector_store %arg7[%c0_4, %c0_5, %c0_6], %22 {strides = array<i32>} : memref<3x64x128xbf16, #tpu.memory_space<vmem>>, vector<1x64x128xbf16>,
    %cst_7 = arith.constant 0.000000e+00 : f32
    %23 = vector.broadcast %cst_7 : f32 to vector<64x128xf32>
    %24 = arith.select %12, %18, %23 : vector<64x128xi1>, vector<64x128xf32>
    %cst_8 = arith.constant dense<0.000000e+00> : vector<128xf32>
    %25 = vector.multi_reduction <add>, %24, %cst_8 [0] : vector<64x128xf32> to vector<128xf32>
    %26 = vector.shape_cast %25 : vector<128xf32> to vector<1x128xf32>
    %c1 = arith.constant 1 : index
    %c0_9 = arith.constant 0 : index
    %c0_10 = arith.constant 0 : index
    %27 = vector.load %arg1[%c1, %c0_9, %c0_10] : memref<3x64x128xf32, #tpu.memory_space<vmem>>, vector<1x64x128xf32>
    %28 = vector.shape_cast %27 : vector<1x64x128xf32> to vector<64x128xf32>
    %cst_11 = arith.constant 4.560000e-01 : f32
    %29 = vector.broadcast %cst_11 : f32 to vector<64x128xf32>
    %30 = arith.subf %28, %29 : vector<64x128xf32>
    %cst_12 = arith.constant 4.46428585 : f32
    %31 = vector.broadcast %cst_12 : f32 to vector<64x128xf32>
    %32 = arith.mulf %30, %31 : vector<64x128xf32>
    %33 = arith.truncf %32 : vector<64x128xf32> to vector<64x128xbf16>
    %c1_13 = arith.constant 1 : index
    %c0_14 = arith.constant 0 : index
    %c0_15 = arith.constant 0 : index
    %34 = vector.load %arg7[%c1_13, %c0_14, %c0_15] : memref<3x64x128xbf16, #tpu.memory_space<vmem>>, vector<1x64x128xbf16>
    %35 = vector.shape_cast %34 : vector<1x64x128xbf16> to vector<64x128xbf16>
    %36 = vector.shape_cast %33 : vector<64x128xbf16> to vector<1x64x128xbf16>
    tpu.vector_store %arg7[%c1_13, %c0_14, %c0_15], %36 {strides = array<i32>} : memref<3x64x128xbf16, #tpu.memory_space<vmem>>, vector<1x64x128xbf16>,
    %cst_16 = arith.constant 0.000000e+00 : f32
    %37 = vector.broadcast %cst_16 : f32 to vector<64x128xf32>
    %38 = arith.select %12, %32, %37 : vector<64x128xi1>, vector<64x128xf32>
    %cst_17 = arith.constant dense<0.000000e+00> : vector<128xf32>
    %39 = vector.multi_reduction <add>, %38, %cst_17 [0] : vector<64x128xf32> to vector<128xf32>
    %40 = vector.shape_cast %39 : vector<128xf32> to vector<1x128xf32>
    %c2 = arith.constant 2 : index
    %c0_18 = arith.constant 0 : index
    %c0_19 = arith.constant 0 : index
    %41 = vector.load %arg1[%c2, %c0_18, %c0_19] : memref<3x64x128xf32, #tpu.memory_space<vmem>>, vector<1x64x128xf32>
    %42 = vector.shape_cast %41 : vector<1x64x128xf32> to vector<64x128xf32>
    %cst_20 = arith.constant 4.060000e-01 : f32
    %43 = vector.broadcast %cst_20 : f32 to vector<64x128xf32>
    %44 = arith.subf %42, %43 : vector<64x128xf32>
    %cst_21 = arith.constant 4.44444466 : f32
    %45 = vector.broadcast %cst_21 : f32 to vector<64x128xf32>
    %46 = arith.mulf %44, %45 : vector<64x128xf32>
    %47 = arith.truncf %46 : vector<64x128xf32> to vector<64x128xbf16>
    %c2_22 = arith.constant 2 : index
    %c0_23 = arith.constant 0 : index
    %c0_24 = arith.constant 0 : index
    %48 = vector.load %arg7[%c2_22, %c0_23, %c0_24] : memref<3x64x128xbf16, #tpu.memory_space<vmem>>, vector<1x64x128xbf16>
    %49 = vector.shape_cast %48 : vector<1x64x128xbf16> to vector<64x128xbf16>
    %50 = vector.shape_cast %47 : vector<64x128xbf16> to vector<1x64x128xbf16>
    tpu.vector_store %arg7[%c2_22, %c0_23, %c0_24], %50 {strides = array<i32>} : memref<3x64x128xbf16, #tpu.memory_space<vmem>>, vector<1x64x128xbf16>,
    %cst_25 = arith.constant 0.000000e+00 : f32
    %51 = vector.broadcast %cst_25 : f32 to vector<64x128xf32>
    %52 = arith.select %12, %46, %51 : vector<64x128xi1>, vector<64x128xf32>
    %cst_26 = arith.constant dense<0.000000e+00> : vector<128xf32>
    %53 = vector.multi_reduction <add>, %52, %cst_26 [0] : vector<64x128xf32> to vector<128xf32>
    %54 = vector.shape_cast %53 : vector<128xf32> to vector<1x128xf32>
    %c0_27 = arith.constant 0 : index
    %c0_28 = arith.constant 0 : index
    %55 = vector.load %arg10[%c0_27, %c0_28] : memref<8x128xf32, #tpu.memory_space<vmem>>, vector<1x128xf32>
    %56 = arith.addf %55, %26 : vector<1x128xf32>
    %c0_29 = arith.constant 0 : index
    %c0_30 = arith.constant 0 : index
    %57 = vector.load %arg10[%c0_29, %c0_30] : memref<8x128xf32, #tpu.memory_space<vmem>>, vector<1x128xf32>
    tpu.vector_store %arg10[%c0_29, %c0_30], %56 {strides = array<i32>} : memref<8x128xf32, #tpu.memory_space<vmem>>, vector<1x128xf32>,
    %c1_31 = arith.constant 1 : index
    %c0_32 = arith.constant 0 : index
    %58 = vector.load %arg10[%c1_31, %c0_32] : memref<8x128xf32, #tpu.memory_space<vmem>>, vector<1x128xf32>
    %59 = arith.addf %58, %40 : vector<1x128xf32>
    %c1_33 = arith.constant 1 : index
    %c0_34 = arith.constant 0 : index
    %60 = vector.load %arg10[%c1_33, %c0_34] : memref<8x128xf32, #tpu.memory_space<vmem>>, vector<1x128xf32>
    tpu.vector_store %arg10[%c1_33, %c0_34], %59 {strides = array<i32>} : memref<8x128xf32, #tpu.memory_space<vmem>>, vector<1x128xf32>,
    %c2_35 = arith.constant 2 : index
    %c0_36 = arith.constant 0 : index
    %61 = vector.load %arg10[%c2_35, %c0_36] : memref<8x128xf32, #tpu.memory_space<vmem>>, vector<1x128xf32>
    %62 = arith.addf %61, %54 : vector<1x128xf32>
    %c2_37 = arith.constant 2 : index
    %c0_38 = arith.constant 0 : index
    %63 = vector.load %arg10[%c2_37, %c0_38] : memref<8x128xf32, #tpu.memory_space<vmem>>, vector<1x128xf32>
    tpu.vector_store %arg10[%c2_37, %c0_38], %62 {strides = array<i32>} : memref<8x128xf32, #tpu.memory_space<vmem>>, vector<1x128xf32>,
    %c1_i32 = arith.constant 1 : i32
    %64 = arith.cmpi eq, %arg0, %c1_i32 : i32
    %65 = arith.extui %64 : i1 to i32
    %c0_i32_39 = arith.constant 0 : i32
    %66 = arith.cmpi ne, %65, %c0_i32_39 : i32
    scf.if %66 {
      %c0_40 = arith.constant 0 : index
      %c0_41 = arith.constant 0 : index
      %67 = vector.load %arg10[%c0_40, %c0_41] : memref<8x128xf32, #tpu.memory_space<vmem>>, vector<8x128xf32>
      %cst_42 = arith.constant dense<0.000000e+00> : vector<8xf32>
      %68 = vector.multi_reduction <add>, %67, %cst_42 [1] : vector<8x128xf32> to vector<8xf32>
      %69 = vector.shape_cast %68 : vector<8xf32> to vector<8x1xf32>
      %cst_43 = arith.constant 6.10351563E-5 : f32
      %70 = vector.broadcast %cst_43 : f32 to vector<8x1xf32>
      %71 = arith.mulf %69, %70 : vector<8x1xf32>
      %c0_44 = arith.constant 0 : index
      %c0_45 = arith.constant 0 : index
      %72 = vector.load %arg2[%c0_44, %c0_45] : memref<8x32xf32, #tpu.memory_space<vmem>>, vector<8x32xf32>
      %73 = vector.broadcast %71 : vector<8x1xf32> to vector<8x32xf32>
      %74 = arith.mulf %73, %72 : vector<8x32xf32>
      %cst_46 = arith.constant dense<0.000000e+00> : vector<32xf32>
      %75 = vector.multi_reduction <add>, %74, %cst_46 [0] : vector<8x32xf32> to vector<32xf32>
      %76 = vector.shape_cast %75 : vector<32xf32> to vector<1x32xf32>
      %c0_47 = arith.constant 0 : index
      %c0_48 = arith.constant 0 : index
      %77 = vector.load %arg3[%c0_47, %c0_48] : memref<16x32xf32, #tpu.memory_space<vmem>>, vector<16x32xf32>
      %78 = vector.broadcast %76 : vector<1x32xf32> to vector<16x32xf32>
      %79 = arith.addf %77, %78 : vector<16x32xf32>
      %c0_49 = arith.constant 0 : index
      %c0_50 = arith.constant 0 : index
      %80 = vector.load %arg4[%c0_49, %c0_50] : memref<128x32xf32, #tpu.memory_space<vmem>>, vector<128x32xf32>
      %cst_51 = arith.constant dense<0.000000e+00> : vector<16x128xf32>
      %81 = tpu.matmul %79, %80, %cst_51 {dimension_numbers = #tpu.dot_dimension_numbers<[1], [1], [0], [0], [0, 0, 1, 0], [], []>} : vector<16x32xf32>, vector<128x32xf32>, vector<16x128xf32> -> vector<16x128xf32>
      %82 = tpu.iota {dimensions = array<i32: 1>} : vector<16x128xi32>
      %c8_i32 = arith.constant 8 : i32
      %83 = vector.broadcast %c8_i32 : i32 to vector<16x128xi32>
      %84 = arith.cmpi slt, %82, %83 : vector<16x128xi32>
      %85 = arith.negf %81 : vector<16x128xf32>
      %86 = math.exp %85 : vector<16x128xf32>
      %cst_52 = arith.constant 1.000000e+00 : f32
      %87 = vector.broadcast %cst_52 : f32 to vector<16x128xf32>
      %88 = arith.addf %87, %86 : vector<16x128xf32>
      %89 = arith.divf %87, %88 : vector<16x128xf32>
      %cst_53 = arith.constant 0.000000e+00 : f32
      %90 = vector.broadcast %cst_53 : f32 to vector<16x128xf32>
      %91 = arith.select %84, %89, %90 : vector<16x128xi1>, vector<16x128xf32>
      %c0_54 = arith.constant 0 : index
      %c0_55 = arith.constant 0 : index
      %92 = vector.load %arg8[%c0_54, %c0_55] : memref<16x128xf32, #tpu.memory_space<vmem>>, vector<16x128xf32>
      tpu.vector_store %arg8[%c0_54, %c0_55], %91 {strides = array<i32>} : memref<16x128xf32, #tpu.memory_space<vmem>>, vector<16x128xf32>,
      %c0_56 = arith.constant 0 : index
      %c0_57 = arith.constant 0 : index
      %93 = vector.load %arg5[%c0_56, %c0_57] : memref<32x128xf32, #tpu.memory_space<vmem>>, vector<32x128xf32>
      %cst_58 = arith.constant dense<0.000000e+00> : vector<16x128xf32>
      %94 = tpu.matmul %79, %93, %cst_58 {dimension_numbers = #tpu.dot_dimension_numbers<[1], [0], [0], [1], [0, 0, 1, 1], [], []>} : vector<16x32xf32>, vector<32x128xf32>, vector<16x128xf32> -> vector<16x128xf32>
      %c0_59 = arith.constant 0 : index
      %c0_60 = arith.constant 0 : index
      %95 = vector.load %arg6[%c0_59, %c0_60] : memref<1x128xf32, #tpu.memory_space<vmem>>, vector<1x128xf32>
      %96 = vector.broadcast %95 : vector<1x128xf32> to vector<16x128xf32>
      %97 = arith.addf %94, %96 : vector<16x128xf32>
      %98 = tpu.iota {dimensions = array<i32: 1>} : vector<16x128xi32>
      %c4_i32 = arith.constant 4 : i32
      %99 = vector.broadcast %c4_i32 : i32 to vector<16x128xi32>
      %100 = arith.cmpi slt, %98, %99 : vector<16x128xi32>
      %101 = arith.negf %97 : vector<16x128xf32>
      %102 = math.exp %101 : vector<16x128xf32>
      %cst_61 = arith.constant 1.000000e+00 : f32
      %103 = vector.broadcast %cst_61 : f32 to vector<16x128xf32>
      %104 = arith.addf %103, %102 : vector<16x128xf32>
      %105 = arith.divf %103, %104 : vector<16x128xf32>
      %cst_62 = arith.constant 0.000000e+00 : f32
      %106 = vector.broadcast %cst_62 : f32 to vector<16x128xf32>
      %107 = arith.select %100, %105, %106 : vector<16x128xi1>, vector<16x128xf32>
      %c0_63 = arith.constant 0 : index
      %c0_64 = arith.constant 0 : index
      %108 = vector.load %arg9[%c0_63, %c0_64] : memref<16x128xf32, #tpu.memory_space<vmem>>, vector<16x128xf32>
      tpu.vector_store %arg9[%c0_63, %c0_64], %107 {strides = array<i32>} : memref<16x128xf32, #tpu.memory_space<vmem>>, vector<16x128xf32>,
    } else {
    }
    return
  }
  func.func @transform_0(%arg0: i32) -> (i32, i32, i32) {
    %c0_i32 = arith.constant 0 : i32
    %c0_i32_0 = arith.constant 0 : i32
    %c0_i32_1 = arith.constant 0 : i32
    return %c0_i32, %arg0, %c0_i32_0 : i32, i32, i32
  }
  func.func @transform_1(%arg0: i32) -> (i32, i32) {
    %c0_i32 = arith.constant 0 : i32
    %c0_i32_0 = arith.constant 0 : i32
    %c0_i32_1 = arith.constant 0 : i32
    return %c0_i32, %c0_i32_0 : i32, i32
  }
  func.func @transform_2(%arg0: i32) -> (i32, i32) {
    %c0_i32 = arith.constant 0 : i32
    %c0_i32_0 = arith.constant 0 : i32
    %c0_i32_1 = arith.constant 0 : i32
    return %c0_i32, %c0_i32_0 : i32, i32
  }
  func.func @transform_3(%arg0: i32) -> (i32, i32) {
    %c0_i32 = arith.constant 0 : i32
    %c0_i32_0 = arith.constant 0 : i32
    %c0_i32_1 = arith.constant 0 : i32
    return %c0_i32, %c0_i32_0 : i32, i32
  }
  func.func @transform_4(%arg0: i32) -> (i32, i32) {
    %c0_i32 = arith.constant 0 : i32
    %c0_i32_0 = arith.constant 0 : i32
    %c0_i32_1 = arith.constant 0 : i32
    return %c0_i32, %c0_i32_0 : i32, i32
  }
  func.func @transform_5(%arg0: i32) -> (i32, i32) {
    %c0_i32 = arith.constant 0 : i32
    %c0_i32_0 = arith.constant 0 : i32
    %c0_i32_1 = arith.constant 0 : i32
    return %c0_i32, %c0_i32_0 : i32, i32
  }
  func.func @transform_6(%arg0: i32) -> (i32, i32, i32) {
    %c0_i32 = arith.constant 0 : i32
    %c0_i32_0 = arith.constant 0 : i32
    %c0_i32_1 = arith.constant 0 : i32
    return %c0_i32, %arg0, %c0_i32_0 : i32, i32, i32
  }
  func.func @transform_7(%arg0: i32) -> (i32, i32) {
    %c0_i32 = arith.constant 0 : i32
    %c0_i32_0 = arith.constant 0 : i32
    %c0_i32_1 = arith.constant 0 : i32
    return %c0_i32, %c0_i32_0 : i32, i32
  }
  func.func @transform_8(%arg0: i32) -> (i32, i32) {
    %c0_i32 = arith.constant 0 : i32
    %c0_i32_0 = arith.constant 0 : i32
    %c0_i32_1 = arith.constant 0 : i32
    return %c0_i32, %c0_i32_0 : i32, i32
  }
}

</mosaic_0001>

<bundles_post_ra>
// kernel: tpu_custom_call.1
= control target key start
LH: loop header
LB: loop body
LE: loop exit
PB: predicated region body
PF: predicated region fallthrough
CT: control target
= control target key end

     0   :  { %14 = vsyncpa [#allocation4], 0  ;;  %s2052_s0 = inlined_call_operand.hbm [shape: f32[3,128,128], index: 0, kind: input, shape index: {}]   ;;  %s2053_s1 = inlined_call_operand.vmem [shape: f32[8,32], index: 1, kind: input, shape index: {}]   ;;  %s2054_s2 = inlined_call_operand.vmem [shape: f32[16,32], index: 2, kind: input, shape index: {}]   ;;  %s2055_s3 = inlined_call_operand.vmem [shape: f32[128,32], index: 3, kind: input, shape index: {}]   ;;  %s2056_s4 = inlined_call_operand.vmem [shape: f32[32,128], index: 4, kind: input, shape index: {}]   ;;  %s2057_s5 = inlined_call_operand.vmem [shape: f32[1,128], index: 5, kind: input, shape index: {}]   ;;  %s2058_s6 = inlined_call_operand.hbm [shape: bf16[3,128,128], index: 6, kind: output, shape index: {0}]   ;;  %s2059_s7 = inlined_call_operand.hbm [shape: f32[16,128], index: 7, kind: output, shape index: {1}]   ;;  %s2060_s8 = inlined_call_operand.hbm [shape: f32[16,128], index: 8, kind: output, shape index: {2}]  }
   0x1   :  { %16 = vsyncpa [#allocation4 + $0x1], 0 }
   0x2   :  { %17 = vsyncpa [#allocation5], 0 }
   0x3   :  { %19 = vsyncpa [#allocation5 + $0x1], 0 }
   0x4   :  { %20 = vsyncpa [#allocation8], 0  ;;  %s1656_s27 = smov 0   ;;  %s1658_s28 = smov 0  }
   0x5   :  { %s1660_s29 = smov 0   ;;  %s1662_s30 = smov 0  }
   0x6 LB: > { %2064 = sst [smem:[#allocation18_spill]] %s1588_s29  ;;  %s1677_s9 = sadd.s32 4294967295, %s1592_s30   ;;  %s1592_s30 = sphi %s1662_s30, %s2071_s30   ;;  %s1588_s29 = sphi %s1660_s29, %s2073_s29   ;;  %s1584_s28 = sphi %s1658_s28, %s2075_s28   ;;  %s1580_s27 = sphi %s1656_s27, %s2074_s27  }
   0x7   : > { %s1109_s10 = sadd.s32 4294967294, %s1592_s30   ;;  %s1681_s11 = sadd.s32 1, %s1592_s30  }
   0x8   : > { %2065 = sst [smem:[#allocation19_spill]] %s1681_s11  ;;  %s33_s12 = sadd.s32 1, %s1588_s29 }
   0x9   : > { %s30_s13 = ssub.s32 %s1592_s30, %s1681_s11  ;;  %p40_p0 = scmp.ne.s32.totalorder %s1588_s29, %s1584_s28 }
   0xa   : > { %p31_p1 = scmp.eq.s32.totalorder %s30_s13, 0  ;;  %p41_p2 = scmp.eq.s32.totalorder %s1592_s30, 0 }
   0xb   : > { %p46_p3 = scmp.ne.s32.totalorder %s1584_s28, %s1580_s27  ;;  %p47_p4 = scmp.eq.s32.totalorder %s1677_s9, 0 }
   0xc   : > { %s1693_s14 = scalar_select %p31_p1, %s1588_s29, %s33_s12  }
   0xd   : > { %p1695_p5 = por %p41_p2, %p40_p0  ;;  %p1699_p6 = por %p47_p4, %p46_p3 }
   0xe   : > { %2066 = sst [smem:[#allocation20_spill]] %s1693_s14  ;;  %p175_p7 = scmp.eq.s32.totalorder %s1677_s9, 1 }
   0xf   : > { %p181_p8 = scmp.eq.s32.totalorder %s1109_s10, 1  ;;  %p1111_p11 = scmp.ge.s32.totalorder %s1592_s30, 2 }
  0x10   : > { %p1706_p9 = por %p175_p7, %p40_p0 }
  0x11   : > { %p1710_p10 = por %p181_p8, %p46_p3  ;;  %254 = sbr.rel (%p1111_p11) target bundleno = 36 (0x24), region = 36 }
  0x16   : > { %s258_s19 = sand.u32 1, %s1588_s29   ;;  %s1233_s21 = sshll.u32 %s1592_s30, 10 }
  0x17   : > { %s1400_s20 = smul.u32 192, %s258_s19  ;;  %s1594_s22 = smov 2048  }
  0x18   : > { %1404 = sst [smem:[#allocation11]] (%p1695_p5), %s1594_s22  ;;  %s1595_s10 = smov 1024  }
  0x19   : > { %s1403_s23 = scalar_select %p1695_p5, [#allocation0], [#allocation14] }
  0x1a   : > { %s262_s25 = scalar_lea.vmem [#allocation3], %s1400_s20  ;;  %1405 = sst [smem:[#allocation11 + $0x1]] (%p1695_p5), %s1595_s10 }
  0x1b   : > { %s273_s24 = sld [smem:[%s1403_s23]]   ;;  %s281_s26 = sshll.u32 %s262_s25, 4  ;;  %s282_s26 = int_to_ptr.vmem [resolvable:$true] %s281_s26 }
  0x1c   : > { %s1596_s12 = smov 8   ;;  %s268_s29 = scalar_lea.hbm %s2052_s0, %s1233_s21 }
  0x1d   : > { %1406 = sst [smem:[#allocation11 + $0x2]] (%p1695_p5), %s1596_s12  ;;  %s1597_s11 = smov 128  }
  0x1e   : > { %1407 = sst [smem:[#allocation11 + $0x3]] (%p1695_p5), %s1597_s11  ;;  %s259_s23 = scalar_lea.sflag [#allocation4], %s258_s19 }
  0x1f   : > { %1408 = sst [smem:[#allocation11 + $0x4]] (%p1695_p5), %s1597_s11  ;;  %s1598_s25 = smov 131072  }
  0x20   : > { %1409 = sst [smem:[#allocation11 + $0x5]] (%p1695_p5), %s1596_s12 }
  0x21   : > { %s1114_s20 = sshll.u32 %s273_s24, 26 }
  0x22   : > { %s1115_s22 = sadd.s32 134217728, %s1114_s20 }
  0x23   : > { %1410 = dma.general (%p1695_p5), %s268_s29, 3072, %s282_s26, %s259_s23, %s1598_s25, [#allocation11], %s1115_s22, 0  }
  0x24 PF: > { %p1116_p12 = scmp.ge.s32.totalorder %s1592_s30, 1  ;;  %p302_p13 = scmp.lt.s32.totalorder %s1592_s30, 3 }
  0x26   : > { %p303_p0 = pnand %p1116_p12, %p302_p13 }
  0x27   : > { %s1741_s14 = sand.u32 (!%p303_p0), 1, %s1584_s28  }
  0x28   : > { %306 = sbr.rel (%p303_p0) target bundleno = 553 (0x229), region = 44  ;;  %s309_s21 = scalar_lea.sflag (!%p303_p0), [#allocation4], %s1741_s14 }
  0x29   : > { %s1401_s11 = smul.u32 (!%p303_p0), 192, %s1741_s14 }
  0x2b   : > { %s1745_s24 = scalar_lea.vmem (!%p303_p0), [#allocation3], %s1401_s11 }
  0x2d   : > { %1567 = dma.done.wait (%p1699_p6), %s309_s21, 3072  }
  0x2e   : > { %1569 = vsyncadd (%p1699_p6), %s309_s21, 4294964224  ;;  %s1402_s29 = smul.u32 96, %s1741_s14  ;;  %p1117_p1 = scmp.ne.s32.totalorder %s1677_s9, 0 }
  0x30   : > { %s1752_s15 = scalar_lea.vmem [#allocation6], %s1402_s29  ;;  %350 = sbr.rel (%p1117_p1) target bundleno = 55 (0x37), region = 52 }
  0x35   : > { %v1599_v0 = vmov 0.0  }
  0x36   : > { %351 = vst [vmem:[#allocation2] sm:$0xff] %v1599_v0 }
  0x37 PF: > { %v352_v1 = vlaneseq  ;;  %s1118_s19 = sshll.u32 %s1677_s9, 6  ;;  %v397_v2 = vld [vmem:[%s1745_s24] sm:$0xff]  ;;  %v398_v3 = vld [vmem:[%s1745_s24 + $0x8] sm:$0xff]  ;;  %v399_v4 = vld [vmem:[%s1745_s24 + $0x10] sm:$0xff]  ;;  %p1199_p2 = scmp.ne.s32.totalorder %s1677_s9, 1 }
  0x38   : > { %v1759_v5 = vstv %s1118_s19  ;;  %v1119_v6 = vadd.f32 -0.485, %v397_v2  ;;  %v1120_v7 = vadd.f32 -0.485, %v398_v3  ;;  %v400_v8 = vld [vmem:[%s1745_s24 + $0x18] sm:$0xff]  ;;  %v401_v19 = vld [vmem:[%s1745_s24 + $0x20] sm:$0xff] }
  0x39   : > { %v353_v9 = vshrl.u32 %v352_v1, 7  ;;  %v1121_v10 = vadd.f32 -0.485, %v399_v4  ;;  %v1122_v11 = vadd.f32 -0.485, %v400_v8  ;;  %v1762_v12 = vand.u32 127, %v352_v1 }
  0x3a   : > { %v413_v13 = vmul.f32 4.366812, %v1119_v6  ;;  %v414_v14 = vmul.f32 4.366812, %v1120_v7  ;;  %v402_v24 = vld [vmem:[%s1745_s24 + $0x28] sm:$0xff]  ;;  %v403_v50 = vld [vmem:[%s1745_s24 + $0x30] sm:$0xff] }
  0x3b   : > { %v354_v15 = vadd.s32 8, %v353_v9  ;;  %v363_v16 = vadd.s32 %v1759_v5, %v353_v9  ;;  %v355_v17 = vadd.s32 16, %v353_v9  ;;  %v356_v18 = vadd.s32 24, %v353_v9  ;;  %v404_v54 = vld [vmem:[%s1745_s24 + $0x38] sm:$0xff]  ;;  %v1135_v57 = vld [vmem:[%s1745_s24 + $0x40] sm:$0xff]  ;;  %v1136_v61 = vld [vmem:[%s1745_s24 + $0x48] sm:$0xff] }
  0x3c   : > { %v1262_v20 = vpack.c.bf16 %v414_v14, %v413_v13  ;;  %v415_v21 = vmul.f32 4.366812, %v1121_v10  ;;  %v416_v22 = vmul.f32 4.366812, %v1122_v11  ;;  %v357_v23 = vadd.s32 32, %v353_v9  ;;  %v1137_v2 = vld [vmem:[%s1745_s24 + $0x50] sm:$0xff] }
  0x3d   : > { %v364_v25 = vadd.s32 %v1759_v5, %v354_v15  ;;  %v373_v26 = vmul.u32 128, %v363_v16  ;;  %v365_v27 = vadd.s32 %v1759_v5, %v355_v17  ;;  %v366_v28 = vadd.s32 %v1759_v5, %v356_v18  ;;  %v1138_v3 = vld [vmem:[%s1745_s24 + $0x58] sm:$0xff] }
  0x3e   : > { %1263 = vst [vmem:[%s1752_s15] sm:$0xff] %v1262_v20   ;;  %v1267_v29 = vpack.c.bf16 %v416_v22, %v415_v21  ;;  %v358_v30 = vadd.s32 40, %v353_v9  ;;  %v367_v31 = vadd.s32 %v1759_v5, %v357_v23  ;;  %v1123_v32 = vadd.f32 -0.485, %v401_v19 }
  0x3f   : > { %v374_v33 = vmul.u32 128, %v364_v25  ;;  %v1773_v34 = vadd.s32 %v373_v26, %v1762_v12  ;;  %v375_v35 = vmul.u32 128, %v365_v27  ;;  %v1124_v36 = vadd.f32 -0.485, %v402_v24 }
  0x40   : > { %v376_v37 = vmul.u32 128, %v366_v28  ;;  %1319 = vst [vmem:[%s1752_s15 + $0x8] sm:$0xff] %v1267_v29   ;;  %v368_v38 = vadd.s32 %v1759_v5, %v358_v30  ;;  %v377_v39 = vmul.u32 128, %v367_v31  ;;  %v417_v40 = vmul.f32 4.366812, %v1123_v32  ;;  %v1140_v28 = vld [vmem:[%s1745_s24 + $0x68] sm:$0xff] }
  0x41   : > { %v1778_v41 = vadd.s32 %v374_v33, %v1762_v12  ;;  %vm389_vm0 = vcmp.lt.s32.totalorder %v1773_v34, 16384  ;;  %v1782_v42 = vadd.s32 %v375_v35, %v1762_v12  ;;  %v418_v43 = vmul.f32 4.366812, %v1124_v36  ;;  %v1141_v29 = vld [vmem:[%s1745_s24 + $0x70] sm:$0xff]  ;;  %v1142_v30 = vld [vmem:[%s1745_s24 + $0x78] sm:$0xff]  ;;  %v1167_v36 = vld [vmem:[%s1745_s24 + $0x80] sm:$0xff] }
  0x42   : > { %v461_v44 = vsel %vm389_vm0, %v413_v13, 0.0  ;;  %v1787_v45 = vadd.s32 %v376_v37, %v1762_v12  ;;  %v378_v46 = vmul.u32 128, %v368_v38  ;;  %v1790_v47 = vadd.s32 %v377_v39, %v1762_v12 }
  0x43   : > { %vm390_vm1 = vcmp.lt.s32.totalorder %v1778_v41, 16384  ;;  %vm391_vm2 = vcmp.lt.s32.totalorder %v1782_v42, 16384  ;;  %v1272_v48 = vpack.c.bf16 %v418_v43, %v417_v40  ;;  %v359_v49 = vadd.s32 48, %v353_v9 }
  0x44   : > { %v462_v51 = vsel %vm390_vm1, %v414_v14, 0.0  ;;  %vm392_vm3 = vcmp.lt.s32.totalorder %v1787_v45, 16384  ;;  %v463_v52 = vsel %vm391_vm2, %v415_v21, 0.0  ;;  %v1801_v53 = vadd.s32 %v378_v46, %v1762_v12  ;;  %v1139_v21 = vld [vmem:[%s1745_s24 + $0x60] sm:$0xff] }
  0x45   : > { %v469_v55 = vadd.f32 %v462_v51, %v461_v44  ;;  %vm393_vm4 = vcmp.lt.s32.totalorder %v1790_v47, 16384  ;;  %1320 = vst [vmem:[%s1752_s15 + $0x10] sm:$0xff] %v1272_v48   ;;  %v360_v56 = vadd.s32 56, %v353_v9  ;;  %v464_v58 = vsel %vm392_vm3, %v416_v22, 0.0 }
  0x46   : > { %vm394_vm5 = vcmp.lt.s32.totalorder %v1801_v53, 16384  ;;  %v369_v59 = vadd.s32 %v1759_v5, %v359_v49  ;;  %v1125_v60 = vadd.f32 -0.485, %v403_v50  ;;  %v465_v63 = vsel %vm393_vm4, %v417_v40, 0.0 }
  0x47   : > { %v470_v62 = vadd.f32 %v469_v55, %v463_v52  ;;  %v370_v0 = vadd.s32 %v1759_v5, %v360_v56  ;;  %v1126_v1 = vadd.f32 -0.485, %v404_v54  ;;  %v466_v4 = vsel %vm394_vm5, %v418_v43, 0.0  ;;  %v1168_v43 = vld [vmem:[%s1745_s24 + $0x88] sm:$0xff] }
  0x48   : > { %v379_v6 = vmul.u32 128, %v369_v59  ;;  %v419_v7 = vmul.f32 4.366812, %v1125_v60  ;;  %v1143_v8 = vadd.f32 -0.456, %v1135_v57 }
  0x49   : > { %v471_v9 = vadd.f32 %v470_v62, %v464_v58  ;;  %v380_v10 = vmul.u32 128, %v370_v0  ;;  %v420_v11 = vmul.f32 4.366812, %v1126_v1  ;;  %v1144_v13 = vadd.f32 -0.456, %v1136_v61  ;;  %v1169_v61 = vld [vmem:[%s1745_s24 + $0x90] sm:$0xff] }
  0x4a   : > { %v1820_v14 = vadd.s32 %v379_v6, %v1762_v12  ;;  %v499_v15 = vmul.f32 4.464286, %v1143_v8  ;;  %v1145_v5 = vadd.f32 -0.456, %v1137_v2  ;;  %v1146_v16 = vadd.f32 -0.456, %v1138_v3 }
  0x4b   : > { %v472_v17 = vadd.f32 %v471_v9, %v465_v63  ;;  %v1823_v18 = vadd.s32 %v380_v10, %v1762_v12  ;;  %v1277_v19 = vpack.c.bf16 %v420_v11, %v419_v7  ;;  %v500_v20 = vmul.f32 4.464286, %v1144_v13  ;;  %v1170_v62 = vld [vmem:[%s1745_s24 + $0x98] sm:$0xff]  ;;  %v1171_v2 = vld [vmem:[%s1745_s24 + $0xa0] sm:$0xff]  ;;  %v1172_v3 = vld [vmem:[%s1745_s24 + $0xa8] sm:$0xff] }
  0x4c   : > { %vm395_vm6 = vcmp.lt.s32.totalorder %v1820_v14, 16384  ;;  %v548_v22 = vsel %vm389_vm0, %v499_v15, 0.0  ;;  %v501_v23 = vmul.f32 4.464286, %v1145_v5  ;;  %v502_v24 = vmul.f32 4.464286, %v1146_v16 }
  0x4d   : > { %v473_v25 = vadd.f32 %v472_v17, %v466_v4  ;;  %vm396_vm7 = vcmp.lt.s32.totalorder %v1823_v18, 16384  ;;  %1321 = vst [vmem:[%s1752_s15 + $0x18] sm:$0xff] %v1277_v19   ;;  %v467_v26 = vsel %vm395_vm6, %v419_v7, 0.0  ;;  %v1282_v27 = vpack.c.bf16 %v500_v20, %v499_v15  ;;  %v1173_v19 = vld [vmem:[%s1745_s24 + $0xb0] sm:$0xff] }
  0x4e   : > { %v468_v31 = vsel %vm396_vm7, %v420_v11, 0.0  ;;  %v549_v32 = vsel %vm390_vm1, %v500_v20, 0.0  ;;  %v1287_v33 = vpack.c.bf16 %v502_v24, %v501_v23  ;;  %v550_v35 = vsel %vm391_vm2, %v501_v23, 0.0 }
  0x4f   : > { %v474_v37 = vadd.f32 %v473_v25, %v467_v26  ;;  %1322 = vst [vmem:[%s1752_s15 + $0x20] sm:$0xff] %v1282_v27   ;;  %v556_v38 = vadd.f32 %v549_v32, %v548_v22  ;;  %v551_v39 = vsel %vm392_vm3, %v502_v24, 0.0  ;;  %v1147_v40 = vadd.f32 -0.456, %v1139_v21 }
  0x50   : > { %1323 = vst [vmem:[%s1752_s15 + $0x28] sm:$0xff] %v1287_v33   ;;  %v1148_v44 = vadd.f32 -0.456, %v1140_v28  ;;  %v1149_v46 = vadd.f32 -0.456, %v1141_v29  ;;  %v1174_v28 = vld [vmem:[%s1745_s24 + $0xb8] sm:$0xff] }
  0x51   : > { %v1150_v48 = vadd.f32 -0.456, %v1142_v30  ;;  %v475_v49 = vadd.f32 %v474_v37, %v468_v31  ;;  %v557_v50 = vadd.f32 %v556_v38, %v550_v35  ;;  %v503_v51 = vmul.f32 4.464286, %v1147_v40 }
  0x52   : > { %v1175_v52 = vadd.f32 -0.406, %v1167_v36  ;;  %v504_v54 = vmul.f32 4.464286, %v1148_v44  ;;  %v505_v55 = vmul.f32 4.464286, %v1149_v46 }
  0x53   : > { %v506_v56 = vmul.f32 4.464286, %v1150_v48  ;;  %v476_v57 = vrot.slane %v475_v49, 4  ;;  %v558_v58 = vadd.f32 %v557_v50, %v551_v39  ;;  %v552_v59 = vsel %vm393_vm4, %v503_v51, 0.0 }
  0x54   : > { %v1176_v60 = vadd.f32 -0.406, %v1168_v43  ;;  %v1292_v63 = vpack.c.bf16 %v504_v54, %v503_v51  ;;  %v553_v0 = vsel %vm394_vm5, %v504_v54, 0.0  ;;  %v554_v6 = vsel %vm395_vm6, %v505_v55, 0.0  ;;  %v656_v51 = vld [vmem:[#allocation2] sm:$0x1] }
  0x55   : > { %v1297_v1 = vpack.c.bf16 %v506_v56, %v505_v55  ;;  %v559_v4 = vadd.f32 %v558_v58, %v552_v59  ;;  %v555_v7 = vsel %vm396_vm7, %v506_v56, 0.0  ;;  %v586_v8 = vmul.f32 4.4444447, %v1175_v52 }
  0x56   : > { %v477_v9 = vadd.f32 %v476_v57, %v475_v49  ;;  %1324 = vst [vmem:[%s1752_s15 + $0x30] sm:$0xff] %v1292_v63   ;;  %v587_v10 = vmul.f32 4.4444447, %v1176_v60  ;;  %v1177_v11 = vadd.f32 -0.406, %v1169_v61 }
  0x57   : > { %1325 = vst [vmem:[%s1752_s15 + $0x38] sm:$0xff] %v1297_v1   ;;  %v1178_v13 = vadd.f32 -0.406, %v1170_v62  ;;  %v560_v15 = vadd.f32 %v559_v4, %v553_v0  ;;  %v635_v5 = vsel %vm389_vm0, %v586_v8, 0.0  ;;  %v1179_v16 = vadd.f32 -0.406, %v1171_v2 }
  0x58   : > { %v1180_v17 = vadd.f32 -0.406, %v1172_v3  ;;  %v1302_v20 = vpack.c.bf16 %v587_v10, %v586_v8  ;;  %v636_v21 = vsel %vm390_vm1, %v587_v10, 0.0  ;;  %v588_v22 = vmul.f32 4.4444447, %v1177_v11 }
  0x59   : > { %v589_v23 = vmul.f32 4.4444447, %v1178_v13  ;;  %v561_v24 = vadd.f32 %v560_v15, %v554_v6  ;;  %v643_v25 = vadd.f32 %v636_v21, %v635_v5  ;;  %v590_v26 = vmul.f32 4.4444447, %v1179_v16  ;;  %v659_v60 = vld [vmem:[#allocation2 + $0x1] sm:$0x1] }
  0x5a   : > { %v591_v27 = vmul.f32 4.4444447, %v1180_v17  ;;  %1326 = vst [vmem:[%s1752_s15 + $0x40] sm:$0xff] %v1302_v20   ;;  %v637_v34 = vsel %vm391_vm2, %v588_v22, 0.0  ;;  %v1181_v31 = vadd.f32 -0.406, %v1173_v19 }
  0x5b   : > { %v1307_v29 = vpack.c.bf16 %v589_v23, %v588_v22  ;;  %v638_v30 = vsel %vm392_vm3, %v589_v23, 0.0  ;;  %v562_v41 = vadd.f32 %v561_v24, %v555_v7  ;;  %v644_v32 = vadd.f32 %v643_v25, %v637_v34  ;;  %v662_v3 = vld [vmem:[#allocation2 + $0x2] sm:$0x1] }
  0x5c   : > { %v1312_v33 = vpack.c.bf16 %v591_v27, %v590_v26  ;;  %v639_v35 = vsel %vm393_vm4, %v590_v26, 0.0  ;;  %v1182_v36 = vadd.f32 -0.406, %v1174_v28  ;;  %v592_v37 = vmul.f32 4.4444447, %v1181_v31 }
  0x5d   : > { %1327 = vst [vmem:[%s1752_s15 + $0x48] sm:$0xff] %v1307_v29   ;;  %v478_v38 = vrot.slane %v477_v9, 2  ;;  %v563_v39 = vrot.slane %v562_v41, 4  ;;  %v645_v40 = vadd.f32 %v644_v32, %v638_v30  ;;  %v640_v42 = vsel %vm394_vm5, %v591_v27, 0.0 }
  0x5e   : > { %1328 = vst [vmem:[%s1752_s15 + $0x50] sm:$0xff] %v1312_v33   ;;  %v593_v45 = vmul.f32 4.4444447, %v1182_v36  ;;  %v641_v49 = vsel %vm395_vm6, %v592_v37, 0.0 }
  0x5f   : > { %v479_v43 = vadd.f32 %v478_v38, %v477_v9  ;;  %v564_v44 = vadd.f32 %v563_v39, %v562_v41  ;;  %v646_v46 = vadd.f32 %v645_v40, %v639_v35 }
  0x60   : > { %v1317_v48 = vpack.c.bf16 %v593_v45, %v592_v37  ;;  %v642_v54 = vsel %vm396_vm7, %v593_v45, 0.0 }
  0x61   : > { %v480_v47 = vrot.slane %v479_v43, 1  ;;  %v647_v50 = vadd.f32 %v646_v46, %v640_v42  ;;  %v565_v52 = vrot.slane %v564_v44, 2 }
  0x62   : > { %1329 = vst [vmem:[%s1752_s15 + $0x58] sm:$0xff] %v1317_v48  }
  0x63   : > { %v481_v55 = vadd.f32 %v480_v47, %v479_v43  ;;  %v648_v56 = vadd.f32 %v647_v50, %v641_v49  ;;  %v566_v53 = vadd.f32 %v565_v52, %v564_v44 }
  0x65   : > { %v657_v57 = vadd.f32 %v656_v51, %v481_v55  ;;  %v649_v58 = vadd.f32 %v648_v56, %v642_v54  ;;  %v567_v59 = vrot.slane %v566_v53, 1 }
  0x67   : > { %658 = vst [vmem:[#allocation2] sm:$0x1] %v657_v57  ;;  %v650_v61 = vrot.slane %v649_v58, 4  ;;  %v568_v62 = vadd.f32 %v567_v59, %v566_v53 }
  0x69   : > { %v651_v14 = vadd.f32 %v650_v61, %v649_v58  ;;  %v660_v63 = vadd.f32 %v659_v60, %v568_v62 }
  0x6b   : > { %661 = vst [vmem:[#allocation2 + $0x1] sm:$0x1] %v660_v63  ;;  %v652_v0 = vrot.slane %v651_v14, 2 }
  0x6d   : > { %v653_v1 = vadd.f32 %v652_v0, %v651_v14 }
  0x6f   : > { %v654_v2 = vrot.slane %v653_v1, 1 }
  0x71   : > { %v655_v4 = vadd.f32 %v654_v2, %v653_v1  ;;  %668 = sbr.rel (%p1199_p2) target bundleno = 514 (0x202), region = 56 }
  0x73   : > { %v663_v18 = vadd.f32 %v662_v3, %v655_v4 }
  0x75   : > { %664 = vst [vmem:[#allocation2 + $0x2] sm:$0x1] %v663_v18 }
  0x76   : > { %vm675_vm8 = vcmask 261120   ;;  %v702_v7 = vld [vmem:[%s2055_s3 + $0x78] sm:$0xff]  ;;  %v701_v8 = vld [vmem:[%s2055_s3 + $0x70] sm:$0xff]  ;;  %v700_v9 = vld [vmem:[%s2055_s3 + $0x68] sm:$0xff]  ;;  %vm832_vm9 = vcmp.lt.s32.totalorder %v1762_v12, 8  ;;  %vm935_vm10 = vcmp.lt.s32.totalorder %v1762_v12, 4 }
  0x77   : > { %1354 = vmatprep.subr.msk.mxu0 %vm675_vm8, %v702_v7  ;;  %v699_v10 = vld [vmem:[%s2055_s3 + $0x60] sm:$0xff]  ;;  %v698_v11 = vld [vmem:[%s2055_s3 + $0x58] sm:$0xff]  ;;  %v697_v13 = vld [vmem:[%s2055_s3 + $0x50] sm:$0xff] }
  0x78   : > { %1355 = vmatpush3.xpose.msk.msra.mxu0 %vm675_vm8, %v702_v7  ;;  %v696_v15 = vld [vmem:[%s2055_s3 + $0x48] sm:$0xff]  ;;  %v852_v5 = vld [vmem:[%s2056_s4 + $0x18] sm:$0xff]  ;;  %v851_v16 = vld [vmem:[%s2056_s4 + $0x10] sm:$0xff] }
  0x79   : > { %1356 = vmatprep.subr.msk.mxu0 %vm675_vm8, %v701_v8  ;;  %1389 = vmatprep.subr.mxu1 %v852_v5  ;;  %v850_v17 = vld [vmem:[%s2056_s4 + $0x8] sm:$0xff]  ;;  %v695_v19 = vld [vmem:[%s2055_s3 + $0x40] sm:$0xff]  ;;  %v694_v21 = vld [vmem:[%s2055_s3 + $0x38] sm:$0xff] }
  0x7a   : > { %1390 = vmatpush3.msra.mxu1 %v852_v5  ;;  %v849_v20 = vld [vmem:[%s2056_s4] sm:$0xff]  ;;  %v693_v22 = vld [vmem:[%s2055_s3 + $0x30] sm:$0xff]  ;;  %v692_v23 = vld [vmem:[%s2055_s3 + $0x28] sm:$0xff] }
  0x7b   : > { %1391 = vmatprep.subr.mxu1 %v851_v16  ;;  %v691_v24 = vld [vmem:[%s2055_s3 + $0x20] sm:$0xff]  ;;  %v690_v25 = vld [vmem:[%s2055_s3 + $0x18] sm:$0xff]  ;;  %v689_v26 = vld [vmem:[%s2055_s3 + $0x10] sm:$0xff] }
  0x7c   : > { %v669_v6 = vld [vmem:[#allocation2] sm:$0xff]  ;;  %1357 = vmatpush3.xpose.msk.msra.mxu0 %vm675_vm8, %v701_v8  ;;  %1392 = vmatpush3.msra.mxu1 %v851_v16  ;;  %v688_v27 = vld [vmem:[%s2055_s3 + $0x8] sm:$0xff] }
  0x7d   : > { %670 = vadd.xlane.f32.xlu0 %v669_v6  ;;  %1358 = vmatprep.subr.msk.mxu0 %vm675_vm8, %v700_v9  ;;  %v687_v28 = vld [vmem:[%s2055_s3] sm:$0xff]  ;;  %v684_v39 = vld [vmem:[%s2054_s2 + $0x8] sm:$0xff] }
  0x7e   : > { %1393 = vmatprep.subr.mxu1 %v850_v17  ;;  %v673_v34 = vld [vmem:[%s2053_s1] sm:$0xff] }
  0x7f   : > { %1394 = vmatpush3.msra.mxu1 %v850_v17  ;;  %v683_v38 = vld [vmem:[%s2054_s2] sm:$0xff] }
  0x80   : > { %1359 = vmatpush3.xpose.msk.msra.mxu0 %vm675_vm8, %v700_v9  ;;  %1395 = vmatprep.subr.mxu1 %v849_v20  ;;  %v1220_v43 = vld [vmem:[%s2057_s5] ss:$0 sm:$0xff] }
  0x81   : > { %1360 = vmatprep.subr.msk.mxu0 %vm675_vm8, %v699_v10  ;;  %1396 = vmatpush3.msra.mxu1 %v849_v20 }
  0x84   : > { %1361 = vmatpush3.xpose.msk.msra.mxu0 %vm675_vm8, %v699_v10 }
  0x85   : > { %1362 = vmatprep.subr.msk.mxu0 %vm675_vm8, %v698_v11 }
  0x88   : > { %1363 = vmatpush3.xpose.msk.msra.mxu0 %vm675_vm8, %v698_v11 }
  0x89   : > { %1364 = vmatprep.subr.msk.mxu0 %vm675_vm8, %v697_v13 }
  0x8c   : > { %1365 = vmatpush3.xpose.msk.msra.mxu0 %vm675_vm8, %v697_v13 }
  0x8d   : > { %1366 = vmatprep.subr.msk.mxu0 %vm675_vm8, %v696_v15 }
  0x90   : > { %1367 = vmatpush3.xpose.msk.msra.mxu0 %vm675_vm8, %v696_v15 }
  0x91   : > { %1368 = vmatprep.subr.msk.mxu0 %vm675_vm8, %v695_v19 }
  0x94   : > { %1369 = vmatpush3.xpose.msk.msra.mxu0 %vm675_vm8, %v695_v19 }
  0x95   : > { %1370 = vmatprep.subr.msk.mxu0 %vm675_vm8, %v694_v21 }
  0x98   : > { %1371 = vmatpush3.xpose.msk.msra.mxu0 %vm675_vm8, %v694_v21 }
  0x99   : > { %1372 = vmatprep.subr.msk.mxu0 %vm675_vm8, %v693_v22 }
  0x9c   : > { %1373 = vmatpush3.xpose.msk.msra.mxu0 %vm675_vm8, %v693_v22 }
  0x9d   : > { %1374 = vmatprep.subr.msk.mxu0 %vm675_vm8, %v692_v23 }
  0xa0   : > { %1375 = vmatpush3.xpose.msk.msra.mxu0 %vm675_vm8, %v692_v23 }
  0xa1   : > { %1376 = vmatprep.subr.msk.mxu0 %vm675_vm8, %v691_v24 }
  0xa4   : > { %1377 = vmatpush3.xpose.msk.msra.mxu0 %vm675_vm8, %v691_v24 }
  0xa5   : > { %1378 = vmatprep.subr.msk.mxu0 %vm675_vm8, %v690_v25 }
  0xa8   : > { %1379 = vmatpush3.xpose.msk.msra.mxu0 %vm675_vm8, %v690_v25 }
  0xa9   : > { %1380 = vmatprep.subr.msk.mxu0 %vm675_vm8, %v689_v26 }
  0xac   : > { %1381 = vmatpush3.xpose.msk.msra.mxu0 %vm675_vm8, %v689_v26 }
  0xad   : > { %1382 = vmatprep.subr.msk.mxu0 %vm675_vm8, %v688_v27 }
  0xb0   : > { %1383 = vmatpush3.xpose.msk.msra.mxu0 %vm675_vm8, %v688_v27 }
  0xb1   : > { %1384 = vmatprep.subr.msk.mxu0 %vm675_vm8, %v687_v28 }
  0xb4   : > { %1385 = vmatpush3.xpose.msk.msra.mxu0 %vm675_vm8, %v687_v28 }
 0x106   : > { %v671_v29 = vpop.xlane.xlu0 %670 }
 0x107   : > { %v672_v30 = vmul.f32 6.1035156e-05, %v671_v29 }
 0x109   : > { %v674_v31 = vmul.f32 %v673_v34, %v672_v30 }
 0x10b   : > { %v676_v41 = vsel %vm675_vm8, %v674_v31, 0.0 }
 0x10c   : > { %v677_v32 = vrot.slane %v676_v41, 4 }
 0x10e   : > { %v678_v33 = vadd.f32 %v677_v32, %v676_v41 }
 0x110   : > { %v679_v35 = vrot.slane %v678_v33, 2 }
 0x112   : > { %v680_v36 = vadd.f32 %v679_v35, %v678_v33 }
 0x114   : > { %v681_v37 = vrot.slane %v680_v36, 1 }
 0x116   : > { %v682_v40 = vadd.f32 %v681_v37, %v680_v36 }
 0x118   : > { %v685_v42 = vadd.f32 %v683_v38, %v682_v40  ;;  %v686_v45 = vadd.f32 %v684_v39, %v682_v40 }
 0x11a   : > { %1386 = vmatprep.mubr.msk.f32.mxu0 %vm675_vm8, %v685_v42  ;;  %1397 = vmatprep.mubr.msk.f32.mxu1 %vm675_vm8, %v685_v42 }
 0x11b   : > { %1387 = vmatmul.mubr.msk.f32.vlgmr.msra.gmra.mxu0 %vm675_vm8, %v686_v45  ;;  %1398 = vmatmul.mubr.msk.f32.vlgmr.msra.gmra.mxu1 %vm675_vm8, %v686_v45 }
 0x1db   : > { %v1388_v44 = vpop.f32.mrf.mxu0  ;;  %v1399_v46 = vpop.f32.mrf.mxu1 }
 0x1dc   : > { %v1219_v48 = vmul.f32 -1.442695, %v1388_v44  ;;  %v932_v49 = vadd.f32 %v1399_v46, %v1220_v43 }
 0x1dd   : > { %v823_v47 = vpop.f32.mrf.mxu0  ;;  %v926_v50 = vpop.f32.mrf.mxu1 }
 0x1de   : > { %1486 = vpow2.f32 %v1219_v48  ;;  %v1224_v51 = vmul.f32 -1.442695, %v932_v49  ;;  %v1218_v52 = vmul.f32 -1.442695, %v823_v47  ;;  %v927_v54 = vadd.f32 %v1220_v43, %v926_v50 }
 0x1e0   : > { %1488 = vpow2.f32 %v1224_v51  ;;  %v1223_v55 = vmul.f32 -1.442695, %v927_v54 }
 0x1e1   : > { %1490 = vpow2.f32 %v1218_v52 }
 0x1e2   : > { %1492 = vpow2.f32 %v1223_v55 }
 0x1eb   : > { %v1487_v56 = vpop.eup %1486 }
 0x1ec   : > { %v840_v53 = vadd.f32 1.0, %v1487_v56 }
 0x1ed   : > { %v1489_v57 = vpop.eup %1488 }
 0x1ee   : > { %v1491_v58 = vpop.eup %1490  ;;  %1494 = vrcp.f32 %v840_v53  ;;  %v943_v59 = vadd.f32 1.0, %v1489_v57 }
 0x1ef   : > { %v1493_v60 = vpop.eup %1492  ;;  %v839_v61 = vadd.f32 1.0, %v1491_v58 }
 0x1f0   : > { %1496 = vrcp.f32 %v943_v59  ;;  %v942_v62 = vadd.f32 1.0, %v1493_v60 }
 0x1f1   : > { %1498 = vrcp.f32 %v839_v61 }
 0x1f2   : > { %1500 = vrcp.f32 %v942_v62 }
 0x1fb   : > { %v1495_v14 = vpop.eup %1494 }
 0x1fc   : > { %v846_v63 = vsel %vm832_vm9, %v1495_v14, 0.0 }
 0x1fd   : > { %v1497_v0 = vpop.eup %1496  ;;  %848 = vst [vmem:[#allocation7 + $0x8] sm:$0xff] %v846_v63 }
 0x1fe   : > { %v1499_v1 = vpop.eup %1498  ;;  %v949_v2 = vsel %vm935_vm10, %v1497_v0, 0.0 }
 0x1ff   : > { %v1501_v3 = vpop.eup %1500  ;;  %951 = vst [vmem:[#allocation9 + $0x8] sm:$0xff] %v949_v2  ;;  %v845_v4 = vsel %vm832_vm9, %v1499_v1, 0.0 }
 0x200   : > { %847 = vst [vmem:[#allocation7] sm:$0xff] %v845_v4  ;;  %v948_v18 = vsel %vm935_vm10, %v1501_v3, 0.0 }
 0x201   : > { %950 = vst [vmem:[#allocation9] sm:$0xff] %v948_v18 }
 0x202 PF: > { %s953_s22 = scalar_lea.sflag [#allocation5], %s1741_s14 }
 0x203   : > { %s1258_s23 = sshll.u32 %s1677_s9, 9  ;;  %s976_s25 = sshll.u32 %s1752_s15, 4  ;;  %s977_s25 = int_to_ptr.vmem [resolvable:$true] %s976_s25 }
 0x204   : > { %s965_s24 = scalar_lea.hbm %s2058_s6, %s1258_s23  ;;  %s1600_s29 = smov 512  }
 0x205   : > { %1412 = sst [smem:[#allocation13]] (%p1706_p9), %s1600_s29  ;;  %s1601_s14 = smov 1024  }
 0x206   : > { %1413 = sst [smem:[#allocation13 + $0x1]] (%p1706_p9), %s1601_s14  ;;  %s1602_s19 = smov 8  }
 0x207   : > { %1414 = sst [smem:[#allocation13 + $0x2]] (%p1706_p9), %s1602_s19  ;;  %s1603_s16 = smov 64  }
 0x208   : > { %1415 = sst [smem:[#allocation13 + $0x3]] (%p1706_p9), %s1603_s16  ;;  %s1604_s15 = smov 4  }
 0x209   : > { %1416 = sst [smem:[#allocation13 + $0x4]] (%p1706_p9), %s1603_s16  ;;  %s1605_s26 = smov 131072  }
 0x20a   : > { %1417 = sst [smem:[#allocation13 + $0x5]] (%p1706_p9), %s1604_s15  ;;  %s1606_s10 = smov 0  }
 0x20b   : > { %1418 = dma.general (%p1706_p9), %s977_s25, 1536, %s965_s24, %s953_s22, %s1605_s26, [#allocation13], %s1606_s10, 0  }
 0x20c   : > { %s1607_s12 = smov [#allocation7]  }
 0x20d   : > { %s1002_s13 = sshll.u32 %s1607_s12, 4  ;;  %s1003_s13 = int_to_ptr.vmem [resolvable:$true] %s1002_s13 }
 0x20e   : > { %s1502_s20 = scalar_lea.vmem %s1003_s13, 256  ;;  %p1509_p6 = scmp.lt.s32.totalorder %s1003_s13, %s1003_s13 }
 0x20f   : > { %p1503_p3 = scmp.ne.s32.totalorder %s1003_s13, %s1502_s20  ;;  %p1510_p8 = scmp.lt.s32.totalorder %s1502_s20, %s1502_s20 }
 0x211   : > { %p1504_p4 = pnand %p1503_p3, %p175_p7  ;;  %p1511_p12 = por %p1510_p8, %p1509_p6 }
 0x213   : > { %p1505_p5 = pneg %p1504_p4 }
 0x215   : > { %p1512_p13 = pnand %p1511_p12, %p1505_p5 }
 0x217   : > { %1515 = shalt.err (!%p1512_p13)
}
 0x218   : > { %s1608_s23 = smov 128   ;;  %s1609_s11 = smov 8  }
 0x219   : > { %1420 = dma.vmem_to_hbm [thread:$0]  (%p175_p7), %s1003_s13, 256, %s2059_s7, [#allocation8], %s1608_s23, %s1608_s23, %s1609_s11  }
 0x21a   : > { %s1610_s25 = smov [#allocation9]  }
 0x21b   : > { %s1015_s21 = sshll.u32 %s1610_s25, 4  ;;  %s1016_s21 = int_to_ptr.vmem [resolvable:$true] %s1015_s21 }
 0x21c   : > { %s1526_s24 = scalar_lea.vmem %s1016_s21, 256  ;;  %p1533_p2 = scmp.lt.s32.totalorder %s1016_s21, %s1016_s21 }
 0x21d   : > { %p1527_p9 = scmp.ne.s32.totalorder %s1016_s21, %s1526_s24  ;;  %p1534_p3 = scmp.lt.s32.totalorder %s1526_s24, %s1526_s24 }
 0x21f   : > { %p1528_p0 = pnand %p1527_p9, %p175_p7  ;;  %p1535_p4 = por %p1534_p3, %p1533_p2 }
 0x221   : > { %p1529_p1 = pneg %p1528_p0 }
 0x223   : > { %p1536_p5 = pnand %p1535_p4, %p1529_p1 }
 0x225   : > { %1539 = shalt.err (!%p1536_p5)
}
 0x226   : > { %1422 = dma.vmem_to_hbm [thread:$0]  (%p175_p7), %s1016_s21, 256, %s2060_s8, [#allocation8], %s1608_s23, %s1608_s23, %s1609_s11  }
 0x227   : > { %1571 = dma.done.wait (%p175_p7), [#allocation8], 512  }
 0x228   : > { %1573 = vsyncadd (%p175_p7), [#allocation8], 4294966784 }
 0x229 PF: > { %s1038_s19 = sand.u32 1, %s1580_s27   ;;  %p1429_p6 = pnand %p1111_p11, %p1710_p10 }
 0x22a   : > { %s1039_s16 = scalar_lea.sflag [#allocation5], %s1038_s19 }
 0x22b   : > { %p1430_p8 = pneg %p1429_p6 }
 0x22d   : > { %1575 = dma.done.wait (%p1430_p8), %s1039_s16, 1536  }
 0x22e   : > { %1577 = vsyncadd (%p1430_p8), %s1039_s16, 4294965760  ;;  %s2071_s30 = sld [smem:[#allocation19_spill]]  ;;  %s2074_s27 = smov %s1584_s28 }
 0x22f   : > { %s2072_s15 = sld [smem:[#allocation18_spill]] }
 0x230   : > { %s2073_s29 = sld [smem:[#allocation20_spill]] }
 0x234   : > { %p23_p12 = scmp.ge.s32.totalorder %s2071_s30, 4  }
 0x235   : > { %s2075_s28 = smov %s2072_s15 }
 0x236   :  { %25 = sbr.rel (!%p23_p12) target bundleno = 6 (0x6), region = 127 }
 0x23b   :  { %1044 = vsyncpa [#allocation4], 1 }
 0x23c   :  { %1046 = vsyncpa [#allocation4 + $0x1], 1 }
 0x23d   :  { %1047 = vsyncpa [#allocation5], 1 }
 0x23e   :  { %1049 = vsyncpa [#allocation5 + $0x1], 1 }
 0x23f   :  { %1050 = vsyncpa [#allocation8], 1 }

</bundles_post_ra>
